<compile_context>
chip_gen: v7x
topology: tpu7x:2x2x1
jax: 0.10.0
libtpu: 0.0.40
codegen_flags: <defaults>
</compile_context>

<pallas_src>
import jax
import jax.numpy as jnp
from jax.experimental import pallas as pl
from jax.experimental.pallas import tpu as pltpu


def _time_embedding_kernel(x_ref, w1_ref, b1_ref, w2_ref, b2_ref, o_ref):
    # x_ref : (Bp, n)      f32 activations (cast to weight dtype for the MXU)
    # w1_ref: (n, 4n)      (in, out) layout, bf16 (pre-transposed at init)
    # b1_ref: (1, 4n)      bf16
    # w2_ref: (4n, TN)     (in, out) layout, column-tiled over the out dim
    # b2_ref: (1, TN)
    # o_ref : (Bp, TN)
    x = x_ref[...].astype(w1_ref.dtype)

    # hidden = silu(x @ W1 + b1)   -- f32 accumulation, SiLU in f32 (EUP sigmoid)
    h = jnp.dot(x, w1_ref[...], preferred_element_type=jnp.float32)
    h = h + b1_ref[...].astype(jnp.float32)
    h = h * jax.nn.sigmoid(h)

    # out tile = hidden @ W2[:, tile] + b2[tile]
    out = jnp.dot(h.astype(w2_ref.dtype), w2_ref[...],
                  preferred_element_type=jnp.float32)
    out = out + b2_ref[...].astype(jnp.float32)
    o_ref[...] = out.astype(o_ref.dtype)


def prepare_time_embedding_params(w1, b1, w2, b2, param_dtype=jnp.bfloat16):
    """One-time (init) param prep.

    torch nn.Linear stores weight as (out, in); we transpose ONCE here to
    (in, out) so the kernel's matmuls are plain row-major dots (no transposed
    RHS / relayout risk in-kernel), and cast to bf16 (halves HBM traffic for
    this memory-bound op).  Biases -> (1, out)."""
    hidden = w1.shape[0]
    return (jnp.asarray(w1, param_dtype).T,                     # (n, 4n)
            jnp.asarray(b1, param_dtype).reshape(1, hidden),    # (1, 4n)
            jnp.asarray(w2, param_dtype).T,                     # (4n, 4n)
            jnp.asarray(b2, param_dtype).reshape(1, hidden))    # (1, 4n)


def _num_tensorcores():
    """Best-effort TensorCore-per-chip count (v7x=2, v5e/v6e=1). Fallback 1."""
    try:
        info = pltpu.get_tpu_info()
        for attr in ("num_cores", "cores_per_chip", "num_tensorcores",
                     "tensorcores_per_chip", "tensorcore_count"):
            v = getattr(info, attr, None)
            if isinstance(v, int) and v > 0:
                return v
    except Exception:
        pass
    try:
        v = getattr(jax.devices()[0], "num_cores", None)
        if isinstance(v, int) and v > 0:
            return v
    except Exception:
        pass
    return 1


def time_embedding(x, params):
    """x: (B, n_embed); params from prepare_time_embedding_params. -> (B, 4n)."""
    w1, b1, w2, b2 = params
    B, n_embed = x.shape
    hidden = w1.shape[1]
    assert w1.shape == (n_embed, hidden)
    assert w2.shape == (hidden, hidden)

    # Pad batch (sublane dim) to a multiple of 16: bf16 packed tile is (16,128),
    # keeps the cast / MXU-feed layout clean and stores unmasked.
    B_pad = max(16, ((B + 15) // 16) * 16)
    if B_pad != B:
        x = jnp.pad(x, ((0, B_pad - B), (0, 0)))

    # Generation-aware tiling of linear_2's output columns:
    #   * single-TC chips (v5e/v6e): one full-W2 block -> no grid-step overhead,
    #     no redundant hidden recompute.
    #   * 2-TC chips (v7x): split W2 in halves on a "parallel" axis so each core
    #     streams exactly one tile (perfect balance).  Only taken when the tile
    #     stays a multiple of 128 lanes.
    num_cores = _num_tensorcores()
    if num_cores >= 2 and hidden % num_cores == 0 and (hidden // num_cores) % 128 == 0:
        tn = hidden // num_cores
    else:
        tn = hidden
    grid = (hidden // tn,)
    n_tiles = grid[0]

    itemsize_w = w1.dtype.itemsize
    bytes_accessed = (n_tiles * (x.size * x.dtype.itemsize            # x per tile
                                 + w1.size * itemsize_w               # W1 per tile
                                 + b1.size * itemsize_w)              # b1 per tile
                      + w2.size * itemsize_w                          # W2 once
                      + b2.size * itemsize_w                          # b2 once
                      + B_pad * hidden * x.dtype.itemsize)            # output
    cost = pl.CostEstimate(
        flops=n_tiles * 2 * B_pad * n_embed * hidden     # linear_1 (recomputed per tile)
              + 2 * B_pad * hidden * hidden,             # linear_2 total
        transcendentals=n_tiles * B_pad * hidden,        # sigmoid per tile
        bytes_accessed=bytes_accessed)

    out = pl.pallas_call(
        _time_embedding_kernel,
        out_shape=jax.ShapeDtypeStruct((B_pad, hidden), x.dtype),
        grid=grid,
        in_specs=[
            pl.BlockSpec((B_pad, n_embed), lambda j: (0, 0)),    # x   (full)
            pl.BlockSpec((n_embed, hidden), lambda j: (0, 0)),   # W1  (full)
            pl.BlockSpec((1, hidden), lambda j: (0, 0)),         # b1  (full)
            pl.BlockSpec((hidden, tn), lambda j: (0, j)),        # W2 column tile
            pl.BlockSpec((1, tn), lambda j: (0, j)),             # b2 tile
        ],
        out_specs=pl.BlockSpec((B_pad, tn), lambda j: (0, j)),
        compiler_params=pltpu.CompilerParams(
            dimension_semantics=("parallel",)),
        cost_estimate=cost,
    )(x, w1, b1, w2, b2)
    return out[:B]


def time_embedding_ref(x, w1, b1, w2, b2):
    """f32 reference in torch (out, in) weight layout."""
    h = x @ w1.T + b1
    h = h * jax.nn.sigmoid(h)
    return h @ w2.T + b2


if __name__ == "__main__":
    n_embed = 32
    batch = 2
    hidden = 4 * n_embed

    key = jax.random.PRNGKey(0)
    kx, kw1, kb1, kw2, kb2 = jax.random.split(key, 5)

    x = jax.random.normal(kx, (batch, n_embed), dtype=jnp.float32)
    # torch nn.Linear parameter shapes: weight (out, in), bias (out,)
    w1 = jax.random.normal(kw1, (hidden, n_embed), dtype=jnp.float32) * 0.05
    b1 = jax.random.normal(kb1, (hidden,), dtype=jnp.float32) * 0.05
    w2 = jax.random.normal(kw2, (hidden, hidden), dtype=jnp.float32) * 0.05
    b2 = jax.random.normal(kb2, (hidden,), dtype=jnp.float32) * 0.05

    # Init-time param prep (transpose + bf16 cast happen ONCE, not per forward).
    params = prepare_time_embedding_params(w1, b1, w2, b2)

    out = time_embedding(x, params)
    out = jax.block_until_ready(out)

    ref = time_embedding_ref(x, w1, b1, w2, b2)   # f32 reference
    assert out.shape == (batch, hidden)
    # bf16 weights -> loosened tolerance vs the f32 reference.
    assert jnp.allclose(out, ref, atol=2e-2, rtol=2e-2), "mismatch vs reference"

    print("KERNEL_OK")
</pallas_src>

<mosaic_0001>
module attributes {stable_mosaic.version = 11 : i64} {
  func.func @_time_embedding_kernel(%arg0: i32, %arg1: memref<16x32xf32, #tpu.memory_space<vmem>>, %arg2: memref<32x128xbf16, #tpu.memory_space<vmem>>, %arg3: memref<1x128xbf16, #tpu.memory_space<vmem>>, %arg4: memref<128x128xbf16, #tpu.memory_space<vmem>>, %arg5: memref<1x128xbf16, #tpu.memory_space<vmem>>, %arg6: memref<16x128xf32, #tpu.memory_space<vmem>>) attributes {dimension_semantics = [#tpu.dimension_semantics<parallel>], iteration_bounds = array<i64: 1>, scalar_prefetch = 0 : i64, scratch_operands = 0 : i64, tpu.core_type = #tpu.core_type<tc>, window_params = [{pipeline_mode = #tpu.pipeline_mode<synchronous>, transform_indices = @transform_0, window_bounds = array<i64: 16, 32>}, {pipeline_mode = #tpu.pipeline_mode<synchronous>, transform_indices = @transform_1, window_bounds = array<i64: 32, 128>}, {pipeline_mode = #tpu.pipeline_mode<synchronous>, transform_indices = @transform_2, window_bounds = array<i64: 1, 128>}, {transform_indices = @transform_3, window_bounds = array<i64: 128, 128>}, {transform_indices = @transform_4, window_bounds = array<i64: 1, 128>}, {transform_indices = @transform_5, window_bounds = array<i64: 16, 128>}]} {
    %c0 = arith.constant 0 : index
    %c0_0 = arith.constant 0 : index
    %0 = vector.load %arg1[%c0, %c0_0] : memref<16x32xf32, #tpu.memory_space<vmem>>, vector<16x32xf32>
    %1 = arith.truncf %0 : vector<16x32xf32> to vector<16x32xbf16>
    %c0_1 = arith.constant 0 : index
    %c0_2 = arith.constant 0 : index
    %2 = vector.load %arg2[%c0_1, %c0_2] : memref<32x128xbf16, #tpu.memory_space<vmem>>, vector<32x128xbf16>
    %cst = arith.constant dense<0.000000e+00> : vector<16x128xf32>
    %3 = tpu.matmul %1, %2, %cst {dimension_numbers = #tpu.dot_dimension_numbers<[1], [0], [0], [1], [0, 0, 1, 1], [], []>} : vector<16x32xbf16>, vector<32x128xbf16>, vector<16x128xf32> -> vector<16x128xf32>
    %c0_3 = arith.constant 0 : index
    %c0_4 = arith.constant 0 : index
    %4 = vector.load %arg3[%c0_3, %c0_4] : memref<1x128xbf16, #tpu.memory_space<vmem>>, vector<1x128xbf16>
    %5 = arith.extf %4 : vector<1x128xbf16> to vector<1x128xf32>
    %6 = vector.broadcast %5 : vector<1x128xf32> to vector<16x128xf32>
    %7 = arith.addf %3, %6 : vector<16x128xf32>
    %8 = arith.negf %7 : vector<16x128xf32>
    %9 = math.exp %8 : vector<16x128xf32>
    %cst_5 = arith.constant 1.000000e+00 : f32
    %10 = vector.broadcast %cst_5 : f32 to vector<16x128xf32>
    %11 = arith.addf %10, %9 : vector<16x128xf32>
    %12 = arith.divf %10, %11 : vector<16x128xf32>
    %13 = arith.mulf %7, %12 : vector<16x128xf32>
    %14 = arith.truncf %13 : vector<16x128xf32> to vector<16x128xbf16>
    %c0_6 = arith.constant 0 : index
    %c0_7 = arith.constant 0 : index
    %15 = vector.load %arg4[%c0_6, %c0_7] : memref<128x128xbf16, #tpu.memory_space<vmem>>, vector<128x128xbf16>
    %cst_8 = arith.constant dense<0.000000e+00> : vector<16x128xf32>
    %16 = tpu.matmul %14, %15, %cst_8 {dimension_numbers = #tpu.dot_dimension_numbers<[1], [0], [0], [1], [0, 0, 1, 1], [], []>} : vector<16x128xbf16>, vector<128x128xbf16>, vector<16x128xf32> -> vector<16x128xf32>
    %c0_9 = arith.constant 0 : index
    %c0_10 = arith.constant 0 : index
    %17 = vector.load %arg5[%c0_9, %c0_10] : memref<1x128xbf16, #tpu.memory_space<vmem>>, vector<1x128xbf16>
    %18 = arith.extf %17 : vector<1x128xbf16> to vector<1x128xf32>
    %19 = vector.broadcast %18 : vector<1x128xf32> to vector<16x128xf32>
    %20 = arith.addf %16, %19 : vector<16x128xf32>
    %c0_11 = arith.constant 0 : index
    %c0_12 = arith.constant 0 : index
    %21 = vector.load %arg6[%c0_11, %c0_12] : memref<16x128xf32, #tpu.memory_space<vmem>>, vector<16x128xf32>
    tpu.vector_store %arg6[%c0_11, %c0_12], %20 {strides = array<i32>} : memref<16x128xf32, #tpu.memory_space<vmem>>, vector<16x128xf32>,
    return
  }
  func.func @transform_0(%arg0: i32) -> (i32, i32) {
    %c0_i32 = arith.constant 0 : i32
    %c0_i32_0 = arith.constant 0 : i32
    %c0_i32_1 = arith.constant 0 : i32
    return %c0_i32, %c0_i32_0 : i32, i32
  }
  func.func @transform_1(%arg0: i32) -> (i32, i32) {
    %c0_i32 = arith.constant 0 : i32
    %c0_i32_0 = arith.constant 0 : i32
    %c0_i32_1 = arith.constant 0 : i32
    return %c0_i32, %c0_i32_0 : i32, i32
  }
  func.func @transform_2(%arg0: i32) -> (i32, i32) {
    %c0_i32 = arith.constant 0 : i32
    %c0_i32_0 = arith.constant 0 : i32
    %c0_i32_1 = arith.constant 0 : i32
    return %c0_i32, %c0_i32_0 : i32, i32
  }
  func.func @transform_3(%arg0: i32) -> (i32, i32) {
    %c0_i32 = arith.constant 0 : i32
    %c0_i32_0 = arith.constant 0 : i32
    return %c0_i32, %arg0 : i32, i32
  }
  func.func @transform_4(%arg0: i32) -> (i32, i32) {
    %c0_i32 = arith.constant 0 : i32
    %c0_i32_0 = arith.constant 0 : i32
    return %c0_i32, %arg0 : i32, i32
  }
  func.func @transform_5(%arg0: i32) -> (i32, i32) {
    %c0_i32 = arith.constant 0 : i32
    %c0_i32_0 = arith.constant 0 : i32
    return %c0_i32, %arg0 : i32, i32
  }
}

</mosaic_0001>

<bundles_post_ra>
// kernel: tpu_custom_call.1
= control target key start
LH: loop header
LB: loop body
LE: loop exit
PB: predicated region body
PF: predicated region fallthrough
CT: control target
= control target key end

     0   :  { %10 = vsyncpa [#allocation3], 0  ;;  %s560_s0 = inlined_call_operand.hbm [shape: f32[16,32], index: 0, kind: input, shape index: {}]   ;;  %s561_s1 = inlined_call_operand.hbm [shape: bf16[32,128], index: 1, kind: input, shape index: {}]   ;;  %s562_s2 = inlined_call_operand.vmem [shape: bf16[1,128], index: 2, kind: input, shape index: {}]   ;;  %s563_s3 = inlined_call_operand.hbm [shape: bf16[128,128], index: 3, kind: input, shape index: {}]   ;;  %s564_s4 = inlined_call_operand.vmem [shape: bf16[1,128], index: 4, kind: input, shape index: {}]   ;;  %s565_s5 = inlined_call_operand.hbm [shape: f32[16,128], index: 5, kind: output, shape index: {}]  }
   0x1   :  { %11 = vsyncpa [#allocation6], 0 }
   0x2   :  { %12 = vsyncpa [#allocation4], 0  ;;  %s454_s18 = smov [#allocation5]   ;;  %s360_s22 = scalar_lea.hbm %s561_s1, 256 }
   0x3   :  { %s30_s19 = sshll.u32 %s454_s18, 4  ;;  %p361_p0 = scmp.ne.s32.totalorder %s561_s1, %s360_s22  ;;  %s31_s19 = int_to_ptr.vmem [resolvable:$true] %s30_s19 }
   0x4   :  { %p364_p1 = scmp.lt.u32.totalorder %s360_s22, %s561_s1 }
   0x6   :  { %p366_p2 = pnand %p364_p1, %p361_p0 }
   0x8   :  { %369 = shalt.err (!%p366_p2)
}
   0x9   :  { %s370_s27 = scalar_lea.vmem %s31_s19, 256  ;;  %p375_p4 = scmp.lt.s32.totalorder %s31_s19, %s31_s19 }
   0xa   :  { %p371_p3 = scmp.ne.s32.totalorder %s31_s19, %s370_s27  ;;  %p376_p5 = scmp.lt.s32.totalorder %s370_s27, %s370_s27 }
   0xc   :  { %p377_p6 = por %p376_p5, %p375_p4 }
   0xe   :  { %p378_p7 = pnand %p377_p6, %p371_p3 }
  0x10   :  { %381 = shalt.err (!%p378_p7)
}
  0x11   :  { %s455_s28 = smov 64   ;;  %s456_s29 = smov 4  }
  0x12   :  { %36 = dma.hbm_to_vmem [thread:$0]  %s561_s1, 256, %s31_s19, [#allocation6], %s455_s28, %s455_s28, %s456_s29  }
  0x13   :  { %s457_s7 = smov [#allocation2]   ;;  %s382_s11 = scalar_lea.hbm %s560_s0, 256 }
  0x14   :  { %s18_s8 = sshll.u32 %s457_s7, 4  ;;  %p383_p8 = scmp.ne.s32.totalorder %s560_s0, %s382_s11  ;;  %s19_s8 = int_to_ptr.vmem [resolvable:$true] %s18_s8 }
  0x15   :  { %p386_p9 = scmp.lt.u32.totalorder %s382_s11, %s560_s0 }
  0x17   :  { %p388_p10 = pnand %p386_p9, %p383_p8 }
  0x19   :  { %391 = shalt.err (!%p388_p10)
}
  0x1a   :  { %s392_s16 = scalar_lea.vmem %s19_s8, 256  ;;  %p397_p12 = scmp.lt.s32.totalorder %s19_s8, %s19_s8 }
  0x1b   :  { %p393_p11 = scmp.ne.s32.totalorder %s19_s8, %s392_s16  ;;  %p398_p13 = scmp.lt.s32.totalorder %s392_s16, %s392_s16 }
  0x1d   :  { %p399_p0 = por %p398_p13, %p397_p12 }
  0x1f   :  { %p400_p1 = pnand %p399_p0, %p393_p11 }
  0x21   :  { %403 = shalt.err (!%p400_p1)
}
  0x22   :  { %s458_s1 = smov 128   ;;  %s459_s17 = smov 8  }
  0x23   :  { %24 = dma.hbm_to_vmem [thread:$0]  %s560_s0, 256, %s19_s8, [#allocation3], %s458_s1, %s458_s1, %s459_s17  }
  0x24   :  { %s460_s20 = smov [#allocation7]   ;;  %s404_s24 = scalar_lea.hbm %s563_s3, 1024 }
  0x25   :  { %s44_s21 = sshll.u32 %s460_s20, 4  ;;  %p405_p2 = scmp.ne.s32.totalorder %s563_s3, %s404_s24  ;;  %s45_s21 = int_to_ptr.vmem [resolvable:$true] %s44_s21 }
  0x26   :  { %p408_p3 = scmp.lt.u32.totalorder %s404_s24, %s563_s3 }
  0x28   :  { %p410_p4 = pnand %p408_p3, %p405_p2 }
  0x2a   :  { %413 = shalt.err (!%p410_p4)
}
  0x2b   :  { %s414_s6 = scalar_lea.vmem %s45_s21, 1024  ;;  %p419_p6 = scmp.lt.s32.totalorder %s45_s21, %s45_s21 }
  0x2c   :  { %p415_p5 = scmp.ne.s32.totalorder %s45_s21, %s414_s6  ;;  %p420_p7 = scmp.lt.s32.totalorder %s414_s6, %s414_s6 }
  0x2e   :  { %p421_p8 = por %p420_p7, %p419_p6 }
  0x30   :  { %p422_p9 = pnand %p421_p8, %p415_p5 }
  0x32   :  { %425 = shalt.err (!%p422_p9)
}
  0x33   :  { %50 = dma.hbm_to_vmem [thread:$0]  %s563_s3, 1024, %s45_s21, [#allocation6], %s455_s28, %s455_s28, %s456_s29  }
  0x34   :  { %448 = dma.done.wait [#allocation3], 256  }
  0x35   :  { %449 = vsyncadd [#allocation3], 4294967040 }
  0x36   :  { %450 = dma.done.wait [#allocation6], 1280  }
  0x37   :  { %451 = vsyncadd [#allocation6], 4294966016  ;;  %v461_v0 = vmov 0.0   ;;  %vm462_vm0 = vmmov 0   ;;  %v342_v1 = vld [vmem:[#allocation5] sm:$0xff]   ;;  %v343_v2 = vld [vmem:[#allocation5 + $0x8] sm:$0xff]   ;;  %v72_v14 = vlaneseq }
  0x38   :  { %304 = vmatprep.subr.bf16.mxu0 %v461_v0  ;;  %308 = vmatprep.mubr.msk.bf16.mxu0 %vm462_vm0, %v461_v0  ;;  %v63_v3 = vld [vmem:[#allocation2] sm:$0xff]  ;;  %v64_v4 = vld [vmem:[#allocation2 + $0x8] sm:$0xff]  ;;  %vm88_vm1 = vcmask 261120   ;;  %v346_v8 = vld [vmem:[#allocation7 + $0x10] sm:$0xff]   ;;  %s463_s8 = smov [#allocation8]  }
  0x39   :  { %312 = vmatprep.subr.bf16.mxu1 %v461_v0  ;;  %328 = vmatprep.mubr.msk.bf16.mxu1 %vm462_vm0, %v461_v0  ;;  %v65_v5 = vpack.c.bf16 %v64_v4, %v63_v3  ;;  %v344_v6 = vld [vmem:[#allocation7] sm:$0xff]   ;;  %v345_v7 = vld [vmem:[#allocation7 + $0x8] sm:$0xff]   ;;  %v347_v9 = vld [vmem:[#allocation7 + $0x18] sm:$0xff]   ;;  %v73_v15 = vshrl.u32 %v72_v14, 7  ;;  %s266_s9 = sshll.u32 %s463_s8, 4  ;;  %s267_s9 = int_to_ptr.vmem [resolvable:$true] %s266_s9 }
  0x3a   :  { %305 = vmatpush3.bf16.msra.mxu0 %v342_v1  ;;  %313 = vmatpush3.bf16.msra.mxu1 %v344_v6  ;;  %v348_v10 = vld [vmem:[#allocation7 + $0x20] sm:$0xff]   ;;  %v349_v11 = vld [vmem:[#allocation7 + $0x28] sm:$0xff]   ;;  %v350_v12 = vld [vmem:[#allocation7 + $0x30] sm:$0xff]   ;;  %s426_s10 = scalar_lea.vmem %s267_s9, 256  ;;  %p431_p11 = scmp.lt.s32.totalorder %s267_s9, %s267_s9 }
  0x3b   :  { %306 = vmatprep.subr.bf16.mxu0 %v461_v0  ;;  %314 = vmatprep.subr.bf16.mxu1 %v461_v0  ;;  %v351_v13 = vld [vmem:[#allocation7 + $0x38] sm:$0xff]   ;;  %v70_v16 = vld [vmem:[%s562_s2] sm:$0x1]  ;;  %v74_v18 = vsub.s32 0, %v73_v15  ;;  %p427_p10 = scmp.ne.s32.totalorder %s267_s9, %s426_s10  ;;  %p432_p12 = scmp.lt.s32.totalorder %s426_s10, %s426_s10 }
  0x3c   :  { %v71_v17 = vunpack.c.l.bf16 %v70_v16  ;;  %v164_v37 = vld [vmem:[%s564_s4] sm:$0x1] }
  0x3d   :  { %v165_v38 = vunpack.c.l.bf16 %v164_v37  ;;  %p433_p13 = por %p432_p12, %p431_p11 }
  0x3e   :  { %307 = vmatpush3.bf16.msra.mxu0 %v343_v2  ;;  %315 = vmatpush3.bf16.msra.mxu1 %v345_v7  ;;  %v75_v19 = vrot.slane %v71_v17, %v74_v18 }
  0x3f   :  { %316 = vmatprep.subr.bf16.mxu1 %v461_v0  ;;  %v169_v39 = vrot.slane %v165_v38, %v74_v18  ;;  %p434_p0 = pnand %p433_p13, %p427_p10 }
  0x41   :  { %309 = vmatmul.mubr.msk.bf16.vlgmr.msra.gmra.mrb[0].mxu0 %vm88_vm1, %v65_v5 }
  0x42   :  { %317 = vmatpush3.bf16.msra.mxu1 %v346_v8 }
  0x43   :  { %318 = vmatprep.subr.bf16.mxu1 %v461_v0 }
  0x46   :  { %319 = vmatpush3.bf16.msra.mxu1 %v347_v9 }
  0x47   :  { %320 = vmatprep.subr.bf16.mxu1 %v461_v0 }
  0x4a   :  { %321 = vmatpush3.bf16.msra.mxu1 %v348_v10 }
  0x4b   :  { %322 = vmatprep.subr.bf16.mxu1 %v461_v0 }
  0x4e   :  { %323 = vmatpush3.bf16.msra.mxu1 %v349_v11 }
  0x4f   :  { %324 = vmatprep.subr.bf16.mxu1 %v461_v0 }
  0x52   :  { %325 = vmatpush3.bf16.msra.mxu1 %v350_v12 }
  0x53   :  { %326 = vmatprep.subr.bf16.mxu1 %v461_v0 }
  0x56   :  { %327 = vmatpush3.bf16.msra.mxu1 %v351_v13 }
 0x114   :  { %v126_v20 = vpop.f32.mrb[0].mxu0 }
 0x115   :  { %v127_v21 = vadd.f32 %v126_v20, %v75_v19  ;;  %v310_v22 = vpop.f32.mrb[1].mxu0 }
 0x116   :  { %v129_v23 = vpop.f32.mrb[2].mxu0 }
 0x117   :  { %v282_v24 = vmul.f32 -1.442695, %v127_v21  ;;  %v130_v25 = vadd.f32 %v129_v23, %v75_v19  ;;  %v311_v26 = vpop.f32.mrb[3].mxu0 }
 0x119   :  { %352 = vpow2.f32 %v282_v24  ;;  %v283_v27 = vmul.f32 -1.442695, %v130_v25 }
 0x11b   :  { %354 = vpow2.f32 %v283_v27 }
 0x123   :  { %v353_v28 = vpop.eup %352 }
 0x124   :  { %v139_v29 = vadd.f32 1.0, %v353_v28 }
 0x125   :  { %v355_v30 = vpop.eup %354 }
 0x126   :  { %356 = vrcp.f32 %v139_v29  ;;  %v140_v31 = vadd.f32 1.0, %v355_v30 }
 0x128   :  { %358 = vrcp.f32 %v140_v31 }
 0x130   :  { %v357_v32 = vpop.eup %356 }
 0x131   :  { %v145_v34 = vmul.f32 %v357_v32, %v127_v21 }
 0x132   :  { %v359_v33 = vpop.eup %358 }
 0x133   :  { %v146_v35 = vmul.f32 %v359_v33, %v130_v25 }
 0x135   :  { %v147_v36 = vpack.c.bf16 %v146_v35, %v145_v34 }
 0x137   :  { %329 = vmatmul.mubr.bf16.vlgmr.msra.gmra.mrb[0].mxu1 %v147_v36 }
 0x20a   :  { %v252_v40 = vpop.f32.mrb[0].mxu1 }
 0x20b   :  { %v253_v41 = vadd.f32 %v252_v40, %v169_v39  ;;  %v330_v42 = vpop.f32.mrb[1].mxu1 }
 0x20c   :  { %v255_v43 = vpop.f32.mrb[2].mxu1 }
 0x20d   :  { %259 = vst [vmem:[#allocation8] sm:$0xff] %v253_v41  ;;  %v256_v44 = vadd.f32 %v255_v43, %v169_v39  ;;  %v331_v45 = vpop.f32.mrb[3].mxu1 }
 0x20f   :  { %260 = vst [vmem:[#allocation8 + $0x8] sm:$0xff] %v256_v44 }
 0x210   :  { %437 = shalt.err (!%p434_p0)
}
 0x211   :  { %s438_s12 = scalar_lea.hbm %s565_s5, 256 }
 0x212   :  { %p439_p1 = scmp.ne.s32.totalorder %s565_s5, %s438_s12  ;;  %p442_p2 = scmp.lt.u32.totalorder %s438_s12, %s565_s5 }
 0x214   :  { %p444_p3 = pnand %p442_p2, %p439_p1 }
 0x216   :  { %447 = shalt.err (!%p444_p3)
}
 0x217   :  { %272 = dma.vmem_to_hbm [thread:$0]  %s267_s9, 256, %s565_s5, [#allocation4], %s458_s1, %s458_s1, %s459_s17  }
 0x218   :  { %452 = dma.done.wait [#allocation4], 256  }
 0x219   :  { %453 = vsyncadd [#allocation4], 4294967040 }
 0x21a   :  { %276 = vsyncpa [#allocation3], 1 }
 0x21b   :  { %277 = vsyncpa [#allocation6], 1 }
 0x21c   :  { %278 = vsyncpa [#allocation4], 1 }

</bundles_post_ra>
